<compile_context>
chip_gen: v7x
topology: tpu7x:2x2x1
jax: 0.10.0
libtpu: 0.0.40
codegen_flags: <defaults>
</compile_context>

<pallas_src>
import math

import jax
import jax.numpy as jnp
import numpy as np
from jax.experimental import pallas as pl
from jax.experimental.pallas import tpu as pltpu


def _make_kernel(inv_sqrt_da, mask_mode):
    """Builds the per-(batch, label-tile) kernel body for a given mask mode."""

    def kernel(*refs):
        if mask_mode == "none":
            hidden_ref, w1_ref, b1_ref, labels_ref, out_ref, attn_ref = refs
            mask_ref = None
        else:
            (hidden_ref, w1_ref, b1_ref, labels_ref, mask_ref,
             out_ref, attn_ref) = refs

        h = hidden_ref[...]                          # (N, H)     input dtype
        w1 = w1_ref[...].astype(h.dtype)             # (d_a_p, H)
        labels = labels_ref[...].astype(h.dtype)     # (tile_m, d_a_p)

        # Linear: hidden @ W1^T + b -> (N, d_a_p), f32 accumulation on the MXU.
        proj = jax.lax.dot_general(
            h, w1, (((1,), (1,)), ((), ())),
            preferred_element_type=jnp.float32)
        proj = proj + b1_ref[...].astype(jnp.float32)
        # PyTorch keeps the Linear output in the activation dtype.
        proj = proj.astype(h.dtype)

        # Scores directly in (M, N) layout: labels @ proj^T / sqrt(d_a).
        scores = jax.lax.dot_general(
            labels, proj, (((1,), (1,)), ((), ())),
            preferred_element_type=jnp.float32) * inv_sqrt_da     # (tile_m, N)

        if mask_mode == "token":
            # (1, N) per-token mask, broadcast over the label tile.
            scores = jnp.where(mask_ref[...] == 0, jnp.float32(-1e9), scores)
        elif mask_mode == "full":
            # (tile_m, N) slice of the full mask (already transposed).
            scores = jnp.where(mask_ref[...] == 0, jnp.float32(-1e9), scores)

        # Softmax over the sequence axis (last axis, lane-dense), f32 math.
        mx = jnp.max(scores, axis=-1, keepdims=True)
        e = jnp.exp(scores - mx)
        s = jnp.sum(e, axis=-1, keepdims=True)
        attn = e * pl.reciprocal(s, approx=True)                  # (tile_m, N)

        # Weighted output: attn @ hidden -> (tile_m, H), contracting N.
        weighted = jax.lax.dot_general(
            attn.astype(h.dtype), h, (((1,), (0,)), ((), ())),
            preferred_element_type=jnp.float32)

        out_ref[...] = weighted.astype(out_ref.dtype)
        attn_ref[...] = attn.astype(attn_ref.dtype)

    return kernel


def _round_up(x, m):
    return ((x + m - 1) // m) * m


def label_attention(hidden, w1, b1, label_weight, attn_mask=None, *,
                    tile_m=128, attn_dtype=None):
    """LabelAttention forward.

    hidden:       (B, N, H)   encoder output
    w1:           (d_a, H)    nn.Linear weight (out_features x in_features)
    b1:           (d_a,)      nn.Linear bias
    label_weight: (M, d_a)    label embedding table
    attn_mask:    None, per-token (B, N) / (B, N, 1), or full (B, N, M)

    Returns (weighted_output (B, M, H), attn_weights (B, M, N)).
    """
    B, N, H = hidden.shape
    d_a, H_w = w1.shape
    M, d_a_l = label_weight.shape
    assert H_w == H and d_a_l == d_a

    out_dtype = hidden.dtype
    attn_dtype = out_dtype if attn_dtype is None else jnp.dtype(attn_dtype)
    inv_sqrt_da = 1.0 / math.sqrt(d_a)          # scale uses the *unpadded* d_a

    # ---- pad d_a (lane axis of proj / labels) to a multiple of 128 (zeros) ----
    d_a_p = _round_up(d_a, 128)
    if d_a_p != d_a:
        w1 = jnp.pad(w1, ((0, d_a_p - d_a), (0, 0)))
        b1 = jnp.pad(b1, (0, d_a_p - d_a))
        label_weight = jnp.pad(label_weight, ((0, 0), (0, d_a_p - d_a)))
    b1_2d = b1.reshape(1, d_a_p)

    # ---- pad & tile the label axis M (sublane-aligned tiles) ------------------
    tile_m = _round_up(min(tile_m, _round_up(M, 8)), 8)
    m_pad = _round_up(M, tile_m)
    if m_pad != M:
        label_weight = jnp.pad(label_weight, ((0, m_pad - M), (0, 0)))
    m_tiles = m_pad // tile_m

    # ---- optional attention mask ----------------------------------------------
    mask_mode = "none"
    mask_args, mask_specs = (), []
    if attn_mask is not None:
        am = jnp.asarray(attn_mask)
        if am.ndim == 3 and am.shape[-1] == 1:
            am = am[..., 0]
        if am.ndim == 2:
            # Per-token mask: pass un-broadcast as (B, 1, N).
            mask_mode = "token"
            mask = am.reshape(B, 1, N).astype(jnp.float32)
            mask_specs = [pl.BlockSpec((None, 1, N), lambda b, m: (b, 0, 0))]
        else:
            # Full (B, N, M) mask: transpose to the (M, N) score layout.
            mask_mode = "full"
            mask = jnp.transpose(am, (0, 2, 1)).astype(jnp.float32)
            mask = jnp.pad(mask, ((0, 0), (0, m_pad - M), (0, 0)),
                           constant_values=1.0)
            mask_specs = [pl.BlockSpec((None, tile_m, N), lambda b, m: (b, m, 0))]
        mask_args = (mask,)

    in_specs = [
        pl.BlockSpec((None, N, H), lambda b, m: (b, 0, 0)),       # hidden (resident over m)
        pl.BlockSpec((d_a_p, H), lambda b, m: (0, 0)),            # linear weight
        pl.BlockSpec((1, d_a_p), lambda b, m: (0, 0)),            # linear bias
        pl.BlockSpec((tile_m, d_a_p), lambda b, m: (m, 0)),       # label tile
        *mask_specs,
    ]
    out_specs = [
        pl.BlockSpec((None, tile_m, H), lambda b, m: (b, m, 0)),  # weighted output
        pl.BlockSpec((None, tile_m, N), lambda b, m: (b, m, 0)),  # attn weights (M, N)
    ]
    out_shapes = (
        jax.ShapeDtypeStruct((B, m_pad, H), out_dtype),
        jax.ShapeDtypeStruct((B, m_pad, N), attn_dtype),
    )

    # ---- VMEM budget estimate (double-buffered blocks + temporaries) ----------
    def _nbytes(shape, dtype):
        return int(np.prod(shape)) * jnp.dtype(dtype).itemsize

    block_bytes = (
        2 * _nbytes((N, H), hidden.dtype)
        + 2 * _nbytes((tile_m, d_a_p), label_weight.dtype)
        + 2 * _nbytes((tile_m, H), out_dtype)
        + 2 * _nbytes((tile_m, N), attn_dtype)
        + _nbytes((d_a_p, H), w1.dtype) + _nbytes((1, d_a_p), b1.dtype)
        + 4 * _nbytes((tile_m, N), jnp.float32)       # scores / exp / attn temps
        + _nbytes((N, d_a_p), jnp.float32)            # projection temp
        + (2 * _nbytes((tile_m, N), jnp.float32) if mask_mode == "full" else 0)
    )
    vmem_limit = int(min(64 * 1024 * 1024,
                         max(32 * 1024 * 1024, 2 * block_bytes)))

    grid_spec = pltpu.PrefetchScalarGridSpec(
        num_scalar_prefetch=0,
        grid=(B, m_tiles),
        in_specs=in_specs,
        out_specs=out_specs,
    )

    weighted, attn = pl.pallas_call(
        _make_kernel(inv_sqrt_da, mask_mode),
        grid_spec=grid_spec,
        out_shape=out_shapes,
        compiler_params=pltpu.CompilerParams(
            dimension_semantics=("parallel", "parallel"),
            vmem_limit_bytes=vmem_limit),
    )(hidden, w1, b1_2d, label_weight, *mask_args)

    if m_pad != M:
        weighted = weighted[:, :M, :]
        attn = attn[:, :M, :]
    return weighted, attn


def _reference(hidden, w1, b1, label_weight, attn_mask=None):
    # Plain-JAX reference mirroring the PyTorch forward (eval-mode dropout),
    # computed in f32.
    d_a = label_weight.shape[1]
    h = hidden.astype(jnp.float32)
    out1 = (jnp.einsum("bnh,ah->bna", h, w1.astype(jnp.float32))
            + b1.astype(jnp.float32))
    out2 = jnp.einsum("bna,ma->bnm", out1, label_weight.astype(jnp.float32))
    out3 = out2 / math.sqrt(d_a)
    if attn_mask is not None:
        out3 = jnp.where(attn_mask == 0, -1e9, out3)
    attn = jax.nn.softmax(out3, axis=1)            # softmax over sequence dim N
    attn_t = jnp.transpose(attn, (0, 2, 1))        # (B, M, N)
    weighted = jnp.einsum("bmn,bnh->bmh", attn_t, h)
    return weighted, attn_t


if __name__ == "__main__":
    # Small deterministic shapes consistent with the module.
    B, N = 2, 8               # batch, sequence length
    hidden_size = 32          # d_e
    label_embed_size = 16     # d_a
    M = 12                    # number of ICD-9 labels

    key = jax.random.PRNGKey(0)
    k_h, k_w, k_b, k_l = jax.random.split(key, 4)

    hidden = jax.random.normal(k_h, (B, N, hidden_size), dtype=jnp.float32)
    w1 = jax.random.normal(k_w, (label_embed_size, hidden_size),
                           dtype=jnp.float32) * 0.1
    b1 = jax.random.normal(k_b, (label_embed_size,), dtype=jnp.float32) * 0.1
    label_weight = jax.random.normal(k_l, (M, label_embed_size),
                                     dtype=jnp.float32) * 0.1

    # Tolerances are loosened slightly vs exact f32 because the softmax
    # normalization uses the approximate EUP reciprocal.
    TOL = dict(rtol=5e-3, atol=5e-3)

    # 1) no mask, f32 ----------------------------------------------------------
    weighted, attn = jax.block_until_ready(
        label_attention(hidden, w1, b1, label_weight))
    ref_w, ref_a = _reference(hidden, w1, b1, label_weight)
    np.testing.assert_allclose(np.asarray(weighted), np.asarray(ref_w), **TOL)
    np.testing.assert_allclose(np.asarray(attn), np.asarray(ref_a), **TOL)

    # 2) per-token padding mask (last two tokens masked out) -------------------
    token_mask = jnp.ones((B, N), dtype=jnp.float32).at[:, -2:].set(0.0)
    weighted_m, attn_m = jax.block_until_ready(
        label_attention(hidden, w1, b1, label_weight, attn_mask=token_mask))
    ref_wm, ref_am = _reference(hidden, w1, b1, label_weight,
                                attn_mask=token_mask[:, :, None])
    np.testing.assert_allclose(np.asarray(weighted_m), np.asarray(ref_wm), **TOL)
    np.testing.assert_allclose(np.asarray(attn_m), np.asarray(ref_am), **TOL)

    # 3) full (B, N, M) mask ----------------------------------------------------
    n_idx = jnp.arange(N)[None, :, None]
    m_idx = jnp.arange(M)[None, None, :]
    b_idx = jnp.arange(B)[:, None, None]
    full_mask = ((n_idx + m_idx + b_idx) % 5 != 0).astype(jnp.float32)
    weighted_f, attn_f = jax.block_until_ready(
        label_attention(hidden, w1, b1, label_weight, attn_mask=full_mask))
    ref_wf, ref_af = _reference(hidden, w1, b1, label_weight,
                                attn_mask=full_mask)
    np.testing.assert_allclose(np.asarray(weighted_f), np.asarray(ref_wf), **TOL)
    np.testing.assert_allclose(np.asarray(attn_f), np.asarray(ref_af), **TOL)

    # 4) bf16 inputs: bf16 MXU operands, f32 accumulation ----------------------
    hidden_bf = hidden.astype(jnp.bfloat16)
    w1_bf = w1.astype(jnp.bfloat16)
    b1_bf = b1.astype(jnp.bfloat16)
    labels_bf = label_weight.astype(jnp.bfloat16)
    weighted_bf, attn_bf = jax.block_until_ready(
        label_attention(hidden_bf, w1_bf, b1_bf, labels_bf))
    ref_wbf, ref_abf = _reference(hidden_bf, w1_bf, b1_bf, labels_bf)
    np.testing.assert_allclose(
        np.asarray(weighted_bf.astype(jnp.float32)), np.asarray(ref_wbf),
        rtol=5e-2, atol=5e-2)
    np.testing.assert_allclose(
        np.asarray(attn_bf.astype(jnp.float32)), np.asarray(ref_abf),
        rtol=5e-2, atol=5e-2)

    print("KERNEL_OK")
</pallas_src>

<mosaic_0001>
module attributes {stable_mosaic.version = 11 : i64} {
  func.func @kernel(%arg0: i32, %arg1: i32, %arg2: memref<1x8x32xf32, #tpu.memory_space<vmem>>, %arg3: memref<128x32xf32, #tpu.memory_space<vmem>>, %arg4: memref<1x128xf32, #tpu.memory_space<vmem>>, %arg5: memref<16x128xf32, #tpu.memory_space<vmem>>, %arg6: memref<1x16x32xf32, #tpu.memory_space<vmem>>, %arg7: memref<1x16x8xf32, #tpu.memory_space<vmem>>) attributes {dimension_semantics = [#tpu.dimension_semantics<parallel>, #tpu.dimension_semantics<parallel>], iteration_bounds = array<i64: 2, 1>, scalar_prefetch = 0 : i64, scratch_operands = 0 : i64, tpu.core_type = #tpu.core_type<tc>, window_params = [{transform_indices = @transform_0, window_bounds = array<i64: 1, 8, 32>}, {pipeline_mode = #tpu.pipeline_mode<synchronous>, transform_indices = @transform_1, window_bounds = array<i64: 128, 32>}, {pipeline_mode = #tpu.pipeline_mode<synchronous>, transform_indices = @transform_2, window_bounds = array<i64: 1, 128>}, {transform_indices = @transform_3, window_bounds = array<i64: 16, 128>}, {transform_indices = @transform_4, window_bounds = array<i64: 1, 16, 32>}, {transform_indices = @transform_5, window_bounds = array<i64: 1, 16, 8>}]} {
    %c0 = arith.constant 0 : index
    %c0_0 = arith.constant 0 : index
    %c0_1 = arith.constant 0 : index
    %0 = vector.load %arg2[%c0, %c0_0, %c0_1] : memref<1x8x32xf32, #tpu.memory_space<vmem>>, vector<1x8x32xf32>
    %1 = vector.shape_cast %0 : vector<1x8x32xf32> to vector<8x32xf32>
    %c0_2 = arith.constant 0 : index
    %c0_3 = arith.constant 0 : index
    %2 = vector.load %arg3[%c0_2, %c0_3] : memref<128x32xf32, #tpu.memory_space<vmem>>, vector<128x32xf32>
    %c0_4 = arith.constant 0 : index
    %c0_5 = arith.constant 0 : index
    %3 = vector.load %arg5[%c0_4, %c0_5] : memref<16x128xf32, #tpu.memory_space<vmem>>, vector<16x128xf32>
    %cst = arith.constant dense<0.000000e+00> : vector<8x128xf32>
    %4 = tpu.matmul %1, %2, %cst {dimension_numbers = #tpu.dot_dimension_numbers<[1], [1], [0], [0], [0, 0, 1, 0], [], []>} : vector<8x32xf32>, vector<128x32xf32>, vector<8x128xf32> -> vector<8x128xf32>
    %c0_6 = arith.constant 0 : index
    %c0_7 = arith.constant 0 : index
    %5 = vector.load %arg4[%c0_6, %c0_7] : memref<1x128xf32, #tpu.memory_space<vmem>>, vector<1x128xf32>
    %6 = vector.broadcast %5 : vector<1x128xf32> to vector<8x128xf32>
    %7 = arith.addf %4, %6 : vector<8x128xf32>
    %cst_8 = arith.constant dense<0.000000e+00> : vector<16x8xf32>
    %8 = tpu.matmul %3, %7, %cst_8 {dimension_numbers = #tpu.dot_dimension_numbers<[1], [1], [0], [0], [0, 0, 1, 0], [], []>} : vector<16x128xf32>, vector<8x128xf32>, vector<16x8xf32> -> vector<16x8xf32>
    %cst_9 = arith.constant 2.500000e-01 : f32
    %9 = vector.broadcast %cst_9 : f32 to vector<16x8xf32>
    %10 = arith.mulf %8, %9 : vector<16x8xf32>
    %cst_10 = arith.constant dense<0xFF800000> : vector<16xf32>
    %11 = vector.multi_reduction <maximumf>, %10, %cst_10 [1] : vector<16x8xf32> to vector<16xf32>
    %12 = vector.shape_cast %11 : vector<16xf32> to vector<16x1xf32>
    %13 = vector.broadcast %12 : vector<16x1xf32> to vector<16x8xf32>
    %14 = arith.subf %10, %13 : vector<16x8xf32>
    %15 = math.exp %14 : vector<16x8xf32>
    %cst_11 = arith.constant dense<0.000000e+00> : vector<16xf32>
    %16 = vector.multi_reduction <add>, %15, %cst_11 [1] : vector<16x8xf32> to vector<16xf32>
    %17 = vector.shape_cast %16 : vector<16xf32> to vector<16x1xf32>
    %18 = tpu.reciprocal %17 {approx = true} : vector<16x1xf32> -> vector<16x1xf32>
    %19 = vector.broadcast %18 : vector<16x1xf32> to vector<16x8xf32>
    %20 = arith.mulf %15, %19 : vector<16x8xf32>
    %cst_12 = arith.constant dense<0.000000e+00> : vector<16x32xf32>
    %21 = tpu.matmul %20, %1, %cst_12 {dimension_numbers = #tpu.dot_dimension_numbers<[1], [0], [0], [1], [0, 0, 1, 1], [], []>} : vector<16x8xf32>, vector<8x32xf32>, vector<16x32xf32> -> vector<16x32xf32>
    %c0_13 = arith.constant 0 : index
    %c0_14 = arith.constant 0 : index
    %c0_15 = arith.constant 0 : index
    %22 = vector.load %arg6[%c0_13, %c0_14, %c0_15] : memref<1x16x32xf32, #tpu.memory_space<vmem>>, vector<1x16x32xf32>
    %23 = vector.shape_cast %22 : vector<1x16x32xf32> to vector<16x32xf32>
    %24 = vector.shape_cast %21 : vector<16x32xf32> to vector<1x16x32xf32>
    tpu.vector_store %arg6[%c0_13, %c0_14, %c0_15], %24 {strides = array<i32>} : memref<1x16x32xf32, #tpu.memory_space<vmem>>, vector<1x16x32xf32>,
    %c0_16 = arith.constant 0 : index
    %c0_17 = arith.constant 0 : index
    %c0_18 = arith.constant 0 : index
    %25 = vector.load %arg7[%c0_16, %c0_17, %c0_18] : memref<1x16x8xf32, #tpu.memory_space<vmem>>, vector<1x16x8xf32>
    %26 = vector.shape_cast %25 : vector<1x16x8xf32> to vector<16x8xf32>
    %27 = vector.shape_cast %20 : vector<16x8xf32> to vector<1x16x8xf32>
    tpu.vector_store %arg7[%c0_16, %c0_17, %c0_18], %27 {strides = array<i32>} : memref<1x16x8xf32, #tpu.memory_space<vmem>>, vector<1x16x8xf32>,
    return
  }
  func.func @transform_0(%arg0: i32, %arg1: i32) -> (i32, i32, i32) {
    %c0_i32 = arith.constant 0 : i32
    %c0_i32_0 = arith.constant 0 : i32
    %c0_i32_1 = arith.constant 0 : i32
    return %arg0, %c0_i32, %c0_i32_0 : i32, i32, i32
  }
  func.func @transform_1(%arg0: i32, %arg1: i32) -> (i32, i32) {
    %c0_i32 = arith.constant 0 : i32
    %c0_i32_0 = arith.constant 0 : i32
    %c0_i32_1 = arith.constant 0 : i32
    return %c0_i32, %c0_i32_0 : i32, i32
  }
  func.func @transform_2(%arg0: i32, %arg1: i32) -> (i32, i32) {
    %c0_i32 = arith.constant 0 : i32
    %c0_i32_0 = arith.constant 0 : i32
    %c0_i32_1 = arith.constant 0 : i32
    return %c0_i32, %c0_i32_0 : i32, i32
  }
  func.func @transform_3(%arg0: i32, %arg1: i32) -> (i32, i32) {
    %c0_i32 = arith.constant 0 : i32
    %c0_i32_0 = arith.constant 0 : i32
    return %arg1, %c0_i32 : i32, i32
  }
  func.func @transform_4(%arg0: i32, %arg1: i32) -> (i32, i32, i32) {
    %c0_i32 = arith.constant 0 : i32
    %c0_i32_0 = arith.constant 0 : i32
    return %arg0, %arg1, %c0_i32 : i32, i32, i32
  }
  func.func @transform_5(%arg0: i32, %arg1: i32) -> (i32, i32, i32) {
    %c0_i32 = arith.constant 0 : i32
    %c0_i32_0 = arith.constant 0 : i32
    return %arg0, %arg1, %c0_i32 : i32, i32, i32
  }
}

</mosaic_0001>

<bundles_post_ra>
// kernel: tpu_custom_call.1
= control target key start
LH: loop header
LB: loop body
LE: loop exit
PB: predicated region body
PF: predicated region fallthrough
CT: control target
= control target key end

     0   :  { %11 = vsyncpa [#allocation3], 0  ;;  %s1301_s0 = inlined_call_operand.vmem [shape: f32[2,8,32], index: 0, kind: input, shape index: {}]   ;;  %s1302_s1 = inlined_call_operand.vmem [shape: f32[128,32], index: 1, kind: input, shape index: {}]   ;;  %s1303_s2 = inlined_call_operand.vmem [shape: f32[1,128], index: 2, kind: input, shape index: {}]   ;;  %s1304_s3 = inlined_call_operand.vmem [shape: f32[16,128], index: 3, kind: input, shape index: {}]   ;;  %s1305_s4 = inlined_call_operand.hbm [shape: f32[2,16,32], index: 4, kind: output, shape index: {0}]   ;;  %s1306_s5 = inlined_call_operand.vmem [shape: f32[2,16,8], index: 5, kind: output, shape index: {1}]  }
   0x1   :  { %13 = vsyncpa [#allocation3 + $0x1], 0  ;;  %s1089_s18 = smov 0   ;;  %s1091_s19 = smov 0  }
   0x2   :  { %s1093_s20 = smov 0   ;;  %s1095_s21 = smov 0  }
   0x3   :  { %s1097_s22 = smov 0   ;;  %s1099_s23 = smov 0  }
   0x4 LB: > { %s768_s24 = sadd.s32 4294967295, %s1051_s23   ;;  %s769_s25 = sadd.s32 4294967294, %s1051_s23   ;;  %s1051_s23 = sphi %s1099_s23, %s19_s23   ;;  %s1047_s22 = sphi %s1097_s22, %s1315_s22   ;;  %s1043_s21 = sphi %s1095_s21, %s1314_s21   ;;  %s1039_s20 = sphi %s1093_s20, %s1313_s20   ;;  %s1035_s19 = sphi %s1091_s19, %s1312_s19   ;;  %s1031_s18 = sphi %s1089_s18, %s1311_s18  }
   0x5   : > { %s31_s26 = sadd.s32 1, %s1047_s22  ;;  %s134_s27 = sadd.s32 1, %s1039_s20 }
   0x6   : > { %p33_p0 = scmp.ge.s32.totalorder %s31_s26, 2  ;;  %p144_p1 = scmp.ne.s32.totalorder %s1039_s20, %s1035_s19 }
   0x7   : > { %p145_p2 = scmp.eq.s32.totalorder %s768_s24, 1  ;;  %p150_p3 = scmp.ne.s32.totalorder %s1035_s19, %s1031_s18 }
   0x8   : > { %s1317_s26 = smov (%p33_p0, %s31_s26), 0  ;;  %p151_p5 = scmp.eq.s32.totalorder %s769_s25, 1 }
   0x9   : > { %p1129_p4 = por %p145_p2, %p144_p1  ;;  %s129_s29 = ssub.s32 %s1047_s22, %s1317_s26 }
   0xa   : > { %p773_p6 = scmp.ge.s32.totalorder %s1051_s23, 1  ;;  %p132_p7 = scmp.eq.s32.totalorder %s129_s29, 0 }
   0xb   : > { %p1136_p8 = por %p151_p5, %p150_p3  ;;  %p219_p9 = scmp.lt.s32.totalorder %s1051_s23, 3 }
   0xc   : > { %s1142_s6 = scalar_select %p132_p7, %s1039_s20, %s134_s27  }
   0xd   : > { %p220_p10 = pnand %p773_p6, %p219_p9 }
   0xe   : > { %v282_v0 = vld [vmem:[%s1302_s1] sm:$0xff] (!%p220_p10)  ;;  %v283_v1 = vld [vmem:[%s1302_s1 + $0x8] sm:$0xff] (!%p220_p10)  ;;  %vm307_vm0 = vcmask (!%p220_p10), 261120   ;;  %v1053_v2 = vmov (!%p220_p10), 0.0|0.0   ;;  %vm1054_vm2 = vmmov (!%p220_p10), 0   ;;  %v1055_v5 = vmov (!%p220_p10), 0.0  }
   0xf   : > { %223 = sbr.rel (%p220_p10) target bundleno = 1059 (0x423), region = 36  ;;  %873 = vmatprep.subr.bf16.mxu0 (!%p220_p10), %v1053_v2  ;;  %v874_v3 = vpack.c.bf16 (!%p220_p10), %v283_v1, %v282_v0  ;;  %vm1152_vm1 = vmpackc.low (!%p220_p10), %vm307_vm0, %vm307_vm0  ;;  %860 = vmatprep.mubr.msk.f32.mxu0 (!%p220_p10), %vm1054_vm2, %v1055_v5  ;;  %v284_v6 = vld [vmem:[%s1302_s1 + $0x10] sm:$0xff] (!%p220_p10)  ;;  %v285_v7 = vld [vmem:[%s1302_s1 + $0x18] sm:$0xff] (!%p220_p10)  ;;  %p260_p11 = scmp.lt.s32.totalorder (!%p220_p10), %s1043_s21, 1  ;;  %vm506_vm3 = vcmask (!%p220_p10), 64512  }
  0x10   : > { %v878_v8 = vpack.c.bf16 (!%p220_p10), %v285_v7, %v284_v6  ;;  %v286_v9 = vld [vmem:[%s1302_s1 + $0x20] sm:$0xff] (!%p220_p10)  ;;  %v287_v10 = vld [vmem:[%s1302_s1 + $0x28] sm:$0xff] (!%p220_p10)  ;;  %v288_v12 = vld [vmem:[%s1302_s1 + $0x30] sm:$0xff] (!%p220_p10) }
  0x11   : > { %876 = vmatpush3.bf16.xpose.msk.msra.mxu0 (!%p220_p10), %vm1152_vm1, %v874_v3  ;;  %v882_v11 = vpack.c.bf16 (!%p220_p10), %v287_v10, %v286_v9  ;;  %v289_v13 = vld [vmem:[%s1302_s1 + $0x38] sm:$0xff] (!%p220_p10)  ;;  %v290_v15 = vld [vmem:[%s1302_s1 + $0x40] sm:$0xff] (!%p220_p10)  ;;  %v291_v16 = vld [vmem:[%s1302_s1 + $0x48] sm:$0xff] (!%p220_p10) }
  0x12   : > { %877 = vmatprep.subr.bf16.mxu0 (!%p220_p10), %v1053_v2  ;;  %v886_v14 = vpack.c.bf16 (!%p220_p10), %v289_v13, %v288_v12  ;;  %v890_v17 = vpack.c.bf16 (!%p220_p10), %v291_v16, %v290_v15  ;;  %v292_v18 = vld [vmem:[%s1302_s1 + $0x50] sm:$0xff] (!%p220_p10)  ;;  %v293_v19 = vld [vmem:[%s1302_s1 + $0x58] sm:$0xff] (!%p220_p10)  ;;  %v294_v21 = vld [vmem:[%s1302_s1 + $0x60] sm:$0xff] (!%p220_p10) }
  0x13   : > { %v894_v20 = vpack.c.bf16 (!%p220_p10), %v293_v19, %v292_v18  ;;  %v295_v22 = vld [vmem:[%s1302_s1 + $0x68] sm:$0xff] (!%p220_p10)  ;;  %v296_v24 = vld [vmem:[%s1302_s1 + $0x70] sm:$0xff] (!%p220_p10)  ;;  %v297_v25 = vld [vmem:[%s1302_s1 + $0x78] sm:$0xff] (!%p220_p10) }
  0x14   : > { %v898_v23 = vpack.c.bf16 (!%p220_p10), %v295_v22, %v294_v21  ;;  %v902_v26 = vpack.c.bf16 (!%p220_p10), %v297_v25, %v296_v24  ;;  %v298_v28 = vld [vmem:[%s1304_s3] sm:$0xff] (!%p220_p10)  ;;  %v299_v33 = vld [vmem:[%s1304_s3 + $0x8] sm:$0xff] (!%p220_p10) }
  0x15   : > { %865 = vmatprep.mubr.f32.mxu1 (!%p220_p10), %v298_v28  ;;  %v778_v29 = vld [vmem:[%s1303_s2] ss:$0 sm:$0xff] (!%p220_p10) }
  0x16   : > { %s1214_s9 = scalar_select %p260_p11, %s1043_s21, 1 }
  0x18   : > { %s775_s10 = sshll.u32 %s1214_s9, 3  ;;  %s803_s27 = sshll.u32 %s1214_s9, 4 }
  0x19   : > { %880 = vmatpush3.bf16.xpose.msk.msra.mxu0 %vm1152_vm1, %v878_v8  ;;  %s263_s13 = scalar_lea.vmem %s1301_s0, %s775_s10  ;;  %s279_s8 = scalar_lea.vmem %s1306_s5, %s803_s27 }
  0x1a   : > { %881 = vmatprep.subr.bf16.mxu0 %v1053_v2  ;;  %v281_v27 = vld [vmem:[%s263_s13] sm:$0xff]  ;;  %s246_s10 = sand.u32 1, %s1035_s19   ;;  %s804_s13 = sshll.u32 %s1043_s21, 8 }
  0x1b   : > { %s774_s11 = sshll.u32 %s246_s10, 4  ;;  %s1251_s16 = scalar_lea.hbm %s1305_s4, %s804_s13 }
  0x1c   : > { %s248_s9 = scalar_lea.vmem [#allocation2], %s774_s11  ;;  %s1255_s17 = scalar_lea.sflag [#allocation3], %s246_s10 }
  0x1d   : > { %s639_s12 = sshll.u32 %s248_s9, 4  ;;  %s1056_s21 = smov [#allocation2]   ;;  %s1246_s12 = int_to_ptr.vmem [resolvable:$true] %s639_s12 }
  0x1e   : > { %s973_s24 = scalar_lea.vmem %s1246_s12, 256  ;;  %s977_s25 = sshll.u32 %s1056_s21, 4  ;;  %s978_s25 = int_to_ptr.vmem [resolvable:$false] %s977_s25 }
  0x1f   : > { %p974_p12 = scmp.ne.s32.totalorder %s1246_s12, %s973_s24  ;;  %s979_s27 = scalar_lea.vmem %s978_s25, 512 }
  0x20   : > { %p980_p1 = scmp.lt.s32.totalorder %s1246_s12, %s978_s25  ;;  %p981_p2 = scmp.lt.s32.totalorder %s979_s27, %s973_s24 }
  0x21   : > { %884 = vmatpush3.bf16.xpose.msk.msra.mxu0 %vm1152_vm1, %v882_v11  ;;  %p975_p13 = pnand %p974_p12, %p1129_p4 }
  0x22   : > { %885 = vmatprep.subr.bf16.mxu0 %v1053_v2  ;;  %p982_p3 = por %p981_p2, %p980_p1 }
  0x23   : > { %p976_p0 = pneg %p975_p13 }
  0x25   : > { %p983_p5 = pnand %p982_p3, %p976_p0 }
  0x29   : > { %888 = vmatpush3.bf16.xpose.msk.msra.mxu0 %vm1152_vm1, %v886_v14 }
  0x2a   : > { %889 = vmatprep.subr.bf16.mxu0 %v1053_v2 }
  0x31   : > { %892 = vmatpush3.bf16.xpose.msk.msra.mxu0 %vm1152_vm1, %v890_v17 }
  0x32   : > { %893 = vmatprep.subr.bf16.mxu0 %v1053_v2 }
  0x39   : > { %896 = vmatpush3.bf16.xpose.msk.msra.mxu0 %vm1152_vm1, %v894_v20 }
  0x3a   : > { %897 = vmatprep.subr.bf16.mxu0 %v1053_v2 }
  0x41   : > { %900 = vmatpush3.bf16.xpose.msk.msra.mxu0 %vm1152_vm1, %v898_v23 }
  0x42   : > { %901 = vmatprep.subr.bf16.mxu0 %v1053_v2 }
  0x49   : > { %904 = vmatpush3.bf16.xpose.msk.msra.mxu0 %vm1152_vm1, %v902_v26 }
  0x50   : > { %861 = vmatmul.mubr.msk.f32.vlgmr.msra.gmra.mrb[0].mxu0 %vm307_vm0, %v281_v27 }
 0x123   : > { %v425_v30 = vpop.f32.mrb[0].mxu0 }
 0x124   : > { %v426_v31 = vadd.f32 %v778_v29, %v425_v30  ;;  %v862_v32 = vpop.f32.mrb[1].mxu0 }
 0x126   : > { %863 = vmatprep.subr.mxu1 %v426_v31 }
 0x127   : > { %864 = vmatpush3.xpose.msra.mxu1 %v426_v31 }
 0x128   : > { %868 = vmatprep.subr.mxu1 %v281_v27 }
 0x12a   : > { %866 = vmatmul.mubr.f32.vlgmr.msra.gmra.mrb[0].mxu1 %v299_v33 }
 0x12b   : > { %869 = vmatpush3.msra.mxu1 %v281_v27 }
 0x1fd   : > { %v867_v34 = vpop.f32.mrb[0].mxu1 }
 0x1fe   : > { %v495_v35 = vpop.f32.mrb[1].mxu1  ;;  %v505_v37 = vmul.f32 0.25, %v867_v34 }
 0x1ff   : > { %v504_v36 = vmul.f32 0.25, %v495_v35 }
 0x200   : > { %v510_v39 = vsel %vm506_vm3, %v505_v37, -inf }
 0x201   : > { %v507_v38 = vsel %vm506_vm3, %v504_v36, -inf }
 0x202   : > { %508 = vmax.xlane.f32.xlu0 %v507_v38 }
 0x206   : > { %511 = vmax.xlane.f32.xlu0 %v510_v39 }
 0x28f   : > { %v509_v40 = vpop.xlane.xlu0 %508 }
 0x290   : > { %v513_v41 = vsub.f32 %v504_v36, %v509_v40 }
 0x292   : > { %v515_v42 = vmul.f32 1.442695, %v513_v41 }
 0x293   : > { %v512_v43 = vpop.xlane.xlu0 %511 }
 0x294   : > { %965 = vpow2.f32 %v515_v42  ;;  %v514_v44 = vsub.f32 %v505_v37, %v512_v43 }
 0x296   : > { %v517_v45 = vmul.f32 1.442695, %v514_v44 }
 0x298   : > { %967 = vpow2.f32 %v517_v45 }
 0x29e   : > { %v966_v46 = vpop.eup %965 }
 0x29f   : > { %v519_v47 = vsel %vm506_vm3, %v966_v46, 0.0 }
 0x2a0   : > { %520 = vadd.xlane.f32.xlu1 %v519_v47 }
 0x2a2   : > { %v968_v48 = vpop.eup %967 }
 0x2a3   : > { %v522_v49 = vsel %vm506_vm3, %v968_v48, 0.0 }
 0x2a4   : > { %523 = vadd.xlane.f32.xlu1 %v522_v49 }
 0x32d   : > { %v521_v50 = vpop.xlane.xlu1 %520 }
 0x32e   : > { %969 = vrcp.f32 %v521_v50 }
 0x331   : > { %v524_v51 = vpop.xlane.xlu1 %523 }
 0x332   : > { %971 = vrcp.f32 %v524_v51 }
 0x338   : > { %v970_v52 = vpop.eup %969 }
 0x339   : > { %v527_v53 = vmul.f32 %v970_v52, %v966_v46 }
 0x33b   : > { %870 = vmatprep.mubr.msk.f32.mxu1 %vm506_vm3, %v527_v53  ;;  %612 = vst.msk [vmem:[%s279_s8] sm:$0xff] %vm506_vm3, %v527_v53 }
 0x33c   : > { %v972_v54 = vpop.eup %971 }
 0x33d   : > { %v528_v55 = vmul.f32 %v972_v54, %v968_v48 }
 0x33f   : > { %613 = vst.msk [vmem:[%s279_s8 + $0x8] sm:$0xff] %vm506_vm3, %v528_v55  ;;  %871 = vmatmul.mubr.msk.f32.vlgmr.msra.gmra.mrb[2].mxu1 %vm506_vm3, %v528_v55 }
 0x412   : > { %v872_v56 = vpop.f32.mrb[2].mxu1 }
 0x413   : > { %611 = vst.msk [vmem:[%s248_s9 + $0x8] sm:$0xff] %vm307_vm0, %v872_v56  ;;  %v601_v57 = vpop.f32.mrb[3].mxu1 }
 0x414   : > { %610 = vst.msk [vmem:[%s248_s9] sm:$0xff] %vm307_vm0, %v601_v57 }
 0x415   : > { %986 = shalt.err (!%p983_p5)
}
 0x416   : > { %s987_s29 = scalar_lea.hbm %s1251_s16, 256  ;;  %s991_s10 = scalar_lea.hbm %s1305_s4, 512 }
 0x417   : > { %p988_p6 = scmp.ne.s32.totalorder %s1251_s16, %s987_s29  ;;  %p992_p10 = scmp.lt.u32.totalorder %s1251_s16, %s1305_s4 }
 0x418   : > { %p993_p11 = scmp.lt.u32.totalorder %s991_s10, %s987_s29  ;;  %p995_p13 = scmp.lt.u32.totalorder %s987_s29, %s1251_s16 }
 0x419   : > { %p989_p7 = pnand %p988_p6, %p1129_p4 }
 0x41a   : > { %p994_p12 = por %p993_p11, %p992_p10 }
 0x41b   : > { %p990_p9 = pneg %p989_p7 }
 0x41c   : > { %p996_p0 = por %p995_p13, %p994_p12 }
 0x41e   : > { %p997_p1 = pnand %p996_p0, %p990_p9 }
 0x420   : > { %1000 = shalt.err (!%p997_p1)
}
 0x421   : > { %s1057_s13 = smov 128   ;;  %s1058_s14 = smov 8  }
 0x422   : > { %905 = dma.vmem_to_hbm [thread:$0]  (%p1129_p4), %s1246_s12, 256, %s1251_s16, %s1255_s17, %s1057_s13, %s1057_s13, %s1058_s14  }
 0x423 PF: > { %p911_p2 = scmp.ge.s32.totalorder %s1051_s23, 2  ;;  %s658_s15 = sand.u32 1, %s1031_s18  }
 0x424   : > { %s659_s24 = scalar_lea.sflag [#allocation3], %s658_s15 }
 0x425   : > { %p908_p3 = pnand %p911_p2, %p1136_p8 }
 0x427   : > { %1026 = dma.done.wait (!%p908_p3), %s659_s24, 256  }
 0x428   : > { %1028 = vsyncadd (!%p908_p3), %s659_s24, 4294967040  ;;  %s19_s23 = sadd.s32 1, %s1051_s23   ;;  %s1311_s18 = smov %s1035_s19 }
 0x429   : > { %p16_p5 = scmp.ge.s32.totalorder %s19_s23, 4   ;;  %s1312_s19 = smov %s1039_s20 }
 0x42a   : > { %s1313_s20 = smov %s1142_s6  ;;  %s1314_s21 = smov %s1047_s22 }
 0x42b   : > { %s1315_s22 = smov %s1317_s26  ;;  %18 = sbr.rel (!%p16_p5) target bundleno = 4 (0x4), region = 86 }
 0x432   :  { %676 = vsyncpa [#allocation3], 1 }
 0x433   :  { %678 = vsyncpa [#allocation3 + $0x1], 1 }

</bundles_post_ra>
